<compile_context>
chip_gen: v7x
topology: tpu7x:2x2x1
jax: 0.10.0
libtpu: 0.0.40
codegen_flags: <defaults>
</compile_context>

<pallas_src>
import jax
import jax.numpy as jnp
from jax import lax
from jax.experimental import pallas as pl
from jax.experimental.pallas import tpu as pltpu


# ------------------------------ Pallas kernel -------------------------------

def bfm_kernel(patches_t_ref, w_conv_t_ref, b_conv_ref,
               w_lin_ref, b_lin_ref, bn_scale_ref, bn_shift_ref,
               w_xh_ref, b_gate_ref, w_out_t_ref, b_out_ref, emb_ref,
               ids_ref):
    # ---------------- Encoder: conv (im2col matmul) + ReLU + GAP + Linear + BN ---------
    # Transposed layout: contraction (27) on sublanes, the big B*H*W dim on lanes.
    y_t = jnp.dot(w_conv_t_ref[...], patches_t_ref[...],
                  preferred_element_type=jnp.float32)              # (C_out, B*H*W) f32
    y_t = jnp.maximum(y_t + b_conv_ref[...], 0.0)                  # bias + ReLU (f32 VPU)

    T, B, _ = ids_ref.shape
    c_out, bhw = y_t.shape
    hw = bhw // B

    # Global average pool: per-batch lane slice (aligned, 256 wide) + XLU lane reduce.
    pooled_cols = [jnp.mean(y_t[:, b * hw:(b + 1) * hw], axis=-1, keepdims=True)
                   for b in range(B)]                               # B x (C_out, 1)
    pooled_t = jnp.concatenate(pooled_cols, axis=-1)                # (C_out, B) f32
    pooled = pooled_t.T                                             # (B, C_out) tiny transpose

    # Linear(embed) + eval-mode BatchNorm1d folded into scale/shift (f32 elementwise).
    feat = jnp.dot(pooled.astype(jnp.bfloat16), w_lin_ref[...],
                   preferred_element_type=jnp.float32) + b_lin_ref[...]
    feat = feat * bn_scale_ref[...] + bn_shift_ref[...]             # (B, E) f32

    # ---------------- Decoder: greedy LSTM sampling (num_layers=1) ---------------------
    H = w_xh_ref.shape[1] // 4
    Vp = emb_ref.shape[0]

    w_xh = w_xh_ref[...]        # (E+H, 4H)  bf16, [W_ih^T; W_hh^T] pre-concatenated
    b_gate = b_gate_ref[...]    # (1, 4H)    f32,  b_ih + b_hh
    w_out = w_out_t_ref[...]    # (H, Vp)    bf16, vocab padded to 128 lanes
    b_out = b_out_ref[...]      # (1, Vp)    f32,  padded entries = -1e30
    emb = emb_ref[...]          # (Vp, E)    bf16, padded rows = 0

    def step(t, carry):
        x, h, c = carry                                             # all f32
        xh = jnp.concatenate([x, h], axis=-1).astype(jnp.bfloat16)  # (B, E+H)
        gates = jnp.dot(xh, w_xh, preferred_element_type=jnp.float32) + b_gate  # (B, 4H)

        # 2 EUP pushes over the full 128-lane vreg; gate pieces are static lane slices.
        sig = jax.nn.sigmoid(gates)
        tnh = jnp.tanh(gates)
        i_g = sig[:, 0:H]
        f_g = sig[:, H:2 * H]
        g_g = tnh[:, 2 * H:3 * H]
        o_g = sig[:, 3 * H:4 * H]

        c_new = f_g * c + i_g * g_g
        h_new = o_g * jnp.tanh(c_new)                               # (B, H) f32

        logits = jnp.dot(h_new.astype(jnp.bfloat16), w_out,
                         preferred_element_type=jnp.float32) + b_out  # (B, Vp)

        # greedy argmax with torch.max first-index tie-breaking
        viota = lax.broadcasted_iota(jnp.int32, logits.shape, 1)
        mx = jnp.max(logits, axis=-1, keepdims=True)
        pred = jnp.min(jnp.where(logits == mx, viota, Vp),
                       axis=-1, keepdims=True)                      # (B, 1) int32

        ids_ref[t] = pred                                           # row store at step t

        # embedding lookup of predicted token via one-hot matmul (Vp = 128 lanes)
        onehot = (viota == pred).astype(jnp.bfloat16)               # (B, Vp)
        x_new = jnp.dot(onehot, emb, preferred_element_type=jnp.float32)  # (B, E)
        return x_new, h_new, c_new

    h0 = jnp.zeros((B, H), jnp.float32)
    c0 = jnp.zeros((B, H), jnp.float32)
    lax.fori_loop(0, T, step, (feat, h0, c0))


# -------------------------------- JAX glue ----------------------------------

def im2col_t(x, k=3, pad=1):
    """im2col in transposed layout: (C_in*K*K, B*H*W) so B*H*W is the lane axis."""
    B, C, H, W = x.shape
    xp = jnp.pad(x, ((0, 0), (0, 0), (pad, pad), (pad, pad)))
    cols = []
    for i in range(k):
        for j in range(k):
            cols.append(xp[:, :, i:i + H, j:j + W])                 # (B, C, H, W)
    p = jnp.stack(cols, axis=2)                                     # (B, C, k*k, H, W)
    p = p.transpose(1, 2, 0, 3, 4).reshape(C * k * k, B * H * W)    # (C*k*k, B*H*W)
    return p


def init_params(key, *, in_ch=3, conv_ch=8, embed=32, hidden=32, vocab=64, vocab_pad=128):
    ks = jax.random.split(key, 16)
    K = 3
    bf = jnp.bfloat16

    w_conv = 0.1 * jax.random.normal(ks[0], (conv_ch, in_ch * K * K), jnp.float32)
    b_conv = 0.1 * jax.random.normal(ks[1], (conv_ch, 1), jnp.float32)
    w_lin = 0.1 * jax.random.normal(ks[2], (conv_ch, embed), jnp.float32)
    b_lin = 0.1 * jax.random.normal(ks[3], (1, embed), jnp.float32)

    # eval-mode BatchNorm1d folded into affine scale/shift
    gamma = 1.0 + 0.1 * jax.random.normal(ks[4], (1, embed), jnp.float32)
    beta = 0.1 * jax.random.normal(ks[5], (1, embed), jnp.float32)
    run_mean = 0.1 * jax.random.normal(ks[6], (1, embed), jnp.float32)
    run_var = 1.0 + jax.random.uniform(ks[7], (1, embed), jnp.float32)
    eps = 1e-5
    bn_scale = gamma / jnp.sqrt(run_var + eps)
    bn_shift = beta - run_mean * bn_scale

    # LSTM (num_layers=1), PyTorch gate order (i, f, g, o); input/hidden weights fused.
    w_ih = 0.1 * jax.random.normal(ks[8], (4 * hidden, embed), jnp.float32)
    w_hh = 0.1 * jax.random.normal(ks[9], (4 * hidden, hidden), jnp.float32)
    b_ih = 0.1 * jax.random.normal(ks[10], (4 * hidden,), jnp.float32)
    b_hh = 0.1 * jax.random.normal(ks[11], (4 * hidden,), jnp.float32)
    w_xh = jnp.concatenate([w_ih.T, w_hh.T], axis=0)                # (E+H, 4H)

    w_out = 0.1 * jax.random.normal(ks[12], (vocab, hidden), jnp.float32)
    b_out = 0.1 * jax.random.normal(ks[13], (1, vocab), jnp.float32)
    emb = 0.1 * jax.random.normal(ks[14], (vocab, embed), jnp.float32)

    # pad vocab to a 128-lane multiple; padded logits biased to -1e30 (never argmax'd)
    w_out_p = jnp.zeros((vocab_pad, hidden), jnp.float32).at[:vocab].set(w_out)
    b_out_p = jnp.full((1, vocab_pad), -1e30, jnp.float32).at[:, :vocab].set(b_out)
    emb_p = jnp.zeros((vocab_pad, embed), jnp.float32).at[:vocab].set(emb)

    return dict(
        w_conv_t=w_conv.astype(bf), b_conv=b_conv,
        w_lin=w_lin.astype(bf), b_lin=b_lin,
        bn_scale=bn_scale, bn_shift=bn_shift,
        w_xh=w_xh.astype(bf), b_gate=(b_ih + b_hh)[None, :],
        w_out_t=w_out_p.T.astype(bf), b_out=b_out_p,
        emb=emb_p.astype(bf),
    )


def _bfm_forward_impl(image, params, max_seq_len):
    B = image.shape[0]
    T = max_seq_len
    patches_t = im2col_t(image).astype(jnp.bfloat16)                # (C*9, B*H*W)

    vmem = pl.BlockSpec(memory_space=pltpu.MemorySpace.VMEM)
    raw = pl.pallas_call(
        bfm_kernel,
        out_shape=jax.ShapeDtypeStruct((T, B, 1), jnp.int32),
        in_specs=[vmem] * 12,
        out_specs=vmem,
    )(patches_t, params["w_conv_t"], params["b_conv"],
      params["w_lin"], params["b_lin"], params["bn_scale"], params["bn_shift"],
      params["w_xh"], params["b_gate"], params["w_out_t"], params["b_out"],
      params["emb"])
    return raw[:, :, 0].T                                           # (B, T) int32


bfm_forward = jax.jit(_bfm_forward_impl, static_argnames=("max_seq_len",))


# ---------------------------------- main -------------------------------------

if __name__ == "__main__":
    key = jax.random.PRNGKey(0)
    k_img, k_par = jax.random.split(key)
    image = jax.random.normal(k_img, (2, 3, 16, 16), jnp.float32)   # NCHW
    params = init_params(k_par, in_ch=3, conv_ch=8, embed=32, hidden=32, vocab=64)

    ids = bfm_forward(image, params, max_seq_len=20)
    ids = jax.block_until_ready(ids)

    assert ids.shape == (2, 20), ids.shape
    assert ids.dtype == jnp.int32, ids.dtype
    assert bool(jnp.all((ids >= 0) & (ids < 64)))
    print("KERNEL_OK")
</pallas_src>

<mosaic_0001>
module attributes {stable_mosaic.version = 11 : i64} {
  func.func @bfm_kernel(%arg0: memref<27x512xbf16, #tpu.memory_space<vmem>>, %arg1: memref<8x27xbf16, #tpu.memory_space<vmem>>, %arg2: memref<8x1xf32, #tpu.memory_space<vmem>>, %arg3: memref<8x32xbf16, #tpu.memory_space<vmem>>, %arg4: memref<1x32xf32, #tpu.memory_space<vmem>>, %arg5: memref<1x32xf32, #tpu.memory_space<vmem>>, %arg6: memref<1x32xf32, #tpu.memory_space<vmem>>, %arg7: memref<64x128xbf16, #tpu.memory_space<vmem>>, %arg8: memref<1x128xf32, #tpu.memory_space<vmem>>, %arg9: memref<32x128xbf16, #tpu.memory_space<vmem>>, %arg10: memref<1x128xf32, #tpu.memory_space<vmem>>, %arg11: memref<128x32xbf16, #tpu.memory_space<vmem>>, %arg12: memref<20x2x1xi32, #tpu.memory_space<vmem>>) attributes {dimension_semantics = [], scalar_prefetch = 0 : i64, scratch_operands = 0 : i64, tpu.core_type = #tpu.core_type<tc>} {
    %c0 = arith.constant 0 : index
    %c0_0 = arith.constant 0 : index
    %0 = vector.load %arg1[%c0, %c0_0] : memref<8x27xbf16, #tpu.memory_space<vmem>>, vector<8x27xbf16>
    %c0_1 = arith.constant 0 : index
    %c0_2 = arith.constant 0 : index
    %1 = vector.load %arg0[%c0_1, %c0_2] : memref<27x512xbf16, #tpu.memory_space<vmem>>, vector<27x512xbf16>
    %cst = arith.constant dense<0.000000e+00> : vector<8x512xf32>
    %2 = tpu.matmul %0, %1, %cst {dimension_numbers = #tpu.dot_dimension_numbers<[1], [0], [0], [1], [0, 0, 1, 1], [], []>} : vector<8x27xbf16>, vector<27x512xbf16>, vector<8x512xf32> -> vector<8x512xf32>
    %c0_3 = arith.constant 0 : index
    %c0_4 = arith.constant 0 : index
    %3 = vector.load %arg2[%c0_3, %c0_4] : memref<8x1xf32, #tpu.memory_space<vmem>>, vector<8x1xf32>
    %4 = vector.broadcast %3 : vector<8x1xf32> to vector<8x512xf32>
    %5 = arith.addf %2, %4 : vector<8x512xf32>
    %cst_5 = arith.constant 0.000000e+00 : f32
    %6 = vector.broadcast %cst_5 : f32 to vector<8x512xf32>
    %7 = arith.maximumf %5, %6 : vector<8x512xf32>
    %8 = vector.extract_strided_slice %7 {offsets = [0, 0], sizes = [8, 256], strides = [1, 1]} : vector<8x512xf32> to vector<8x256xf32>
    %cst_6 = arith.constant dense<0.000000e+00> : vector<8xf32>
    %9 = vector.multi_reduction <add>, %8, %cst_6 [1] : vector<8x256xf32> to vector<8xf32>
    %10 = vector.shape_cast %9 : vector<8xf32> to vector<8x1xf32>
    %cst_7 = arith.constant 2.560000e+02 : f32
    %11 = vector.broadcast %cst_7 : f32 to vector<8x1xf32>
    %12 = arith.divf %10, %11 : vector<8x1xf32>
    %13 = vector.extract_strided_slice %7 {offsets = [0, 256], sizes = [8, 256], strides = [1, 1]} : vector<8x512xf32> to vector<8x256xf32>
    %cst_8 = arith.constant dense<0.000000e+00> : vector<8xf32>
    %14 = vector.multi_reduction <add>, %13, %cst_8 [1] : vector<8x256xf32> to vector<8xf32>
    %15 = vector.shape_cast %14 : vector<8xf32> to vector<8x1xf32>
    %cst_9 = arith.constant 2.560000e+02 : f32
    %16 = vector.broadcast %cst_9 : f32 to vector<8x1xf32>
    %17 = arith.divf %15, %16 : vector<8x1xf32>
    %18 = tpu.concatenate %12, %17 in 1 : vector<8x1xf32>, vector<8x1xf32> -> vector<8x2xf32>
    %19 = tpu.transpose %18, [1, 0] : vector<8x2xf32> -> vector<2x8xf32>
    %20 = arith.truncf %19 : vector<2x8xf32> to vector<2x8xbf16>
    %c0_10 = arith.constant 0 : index
    %c0_11 = arith.constant 0 : index
    %21 = vector.load %arg3[%c0_10, %c0_11] : memref<8x32xbf16, #tpu.memory_space<vmem>>, vector<8x32xbf16>
    %cst_12 = arith.constant dense<0.000000e+00> : vector<2x32xf32>
    %22 = tpu.matmul %20, %21, %cst_12 {dimension_numbers = #tpu.dot_dimension_numbers<[1], [0], [0], [1], [0, 0, 1, 1], [], []>} : vector<2x8xbf16>, vector<8x32xbf16>, vector<2x32xf32> -> vector<2x32xf32>
    %c0_13 = arith.constant 0 : index
    %c0_14 = arith.constant 0 : index
    %23 = vector.load %arg4[%c0_13, %c0_14] : memref<1x32xf32, #tpu.memory_space<vmem>>, vector<1x32xf32>
    %24 = vector.broadcast %23 : vector<1x32xf32> to vector<2x32xf32>
    %25 = arith.addf %22, %24 : vector<2x32xf32>
    %c0_15 = arith.constant 0 : index
    %c0_16 = arith.constant 0 : index
    %26 = vector.load %arg5[%c0_15, %c0_16] : memref<1x32xf32, #tpu.memory_space<vmem>>, vector<1x32xf32>
    %27 = vector.broadcast %26 : vector<1x32xf32> to vector<2x32xf32>
    %28 = arith.mulf %25, %27 : vector<2x32xf32>
    %c0_17 = arith.constant 0 : index
    %c0_18 = arith.constant 0 : index
    %29 = vector.load %arg6[%c0_17, %c0_18] : memref<1x32xf32, #tpu.memory_space<vmem>>, vector<1x32xf32>
    %30 = vector.broadcast %29 : vector<1x32xf32> to vector<2x32xf32>
    %31 = arith.addf %28, %30 : vector<2x32xf32>
    %c0_19 = arith.constant 0 : index
    %c0_20 = arith.constant 0 : index
    %32 = vector.load %arg7[%c0_19, %c0_20] : memref<64x128xbf16, #tpu.memory_space<vmem>>, vector<64x128xbf16>
    %c0_21 = arith.constant 0 : index
    %c0_22 = arith.constant 0 : index
    %33 = vector.load %arg8[%c0_21, %c0_22] : memref<1x128xf32, #tpu.memory_space<vmem>>, vector<1x128xf32>
    %c0_23 = arith.constant 0 : index
    %c0_24 = arith.constant 0 : index
    %34 = vector.load %arg9[%c0_23, %c0_24] : memref<32x128xbf16, #tpu.memory_space<vmem>>, vector<32x128xbf16>
    %c0_25 = arith.constant 0 : index
    %c0_26 = arith.constant 0 : index
    %35 = vector.load %arg10[%c0_25, %c0_26] : memref<1x128xf32, #tpu.memory_space<vmem>>, vector<1x128xf32>
    %c0_27 = arith.constant 0 : index
    %c0_28 = arith.constant 0 : index
    %36 = vector.load %arg11[%c0_27, %c0_28] : memref<128x32xbf16, #tpu.memory_space<vmem>>, vector<128x32xbf16>
    %cst_29 = arith.constant 0.000000e+00 : f32
    %37 = vector.broadcast %cst_29 : f32 to vector<2x32xf32>
    %cst_30 = arith.constant 0.000000e+00 : f32
    %38 = vector.broadcast %cst_30 : f32 to vector<2x32xf32>
    %c0_i32 = arith.constant 0 : i32
    %c20_i32 = arith.constant 20 : i32
    %39 = arith.addi %c0_i32, %c20_i32 : i32
    %c1_i32 = arith.constant 1 : i32
    %40:3 = scf.for %arg13 = %c0_i32 to %39 step %c1_i32 iter_args(%arg14 = %31, %arg15 = %37, %arg16 = %38) -> (vector<2x32xf32>, vector<2x32xf32>, vector<2x32xf32>)  : i32 {
      %41 = tpu.concatenate %arg14, %arg15 in 1 : vector<2x32xf32>, vector<2x32xf32> -> vector<2x64xf32>
      %42 = arith.truncf %41 : vector<2x64xf32> to vector<2x64xbf16>
      %cst_32 = arith.constant dense<0.000000e+00> : vector<2x128xf32>
      %43 = tpu.matmul %42, %32, %cst_32 {dimension_numbers = #tpu.dot_dimension_numbers<[1], [0], [0], [1], [0, 0, 1, 1], [], []>} : vector<2x64xbf16>, vector<64x128xbf16>, vector<2x128xf32> -> vector<2x128xf32>
      %44 = vector.broadcast %33 : vector<1x128xf32> to vector<2x128xf32>
      %45 = arith.addf %43, %44 : vector<2x128xf32>
      %46 = arith.negf %45 : vector<2x128xf32>
      %47 = math.exp %46 : vector<2x128xf32>
      %cst_33 = arith.constant 1.000000e+00 : f32
      %48 = vector.broadcast %cst_33 : f32 to vector<2x128xf32>
      %49 = arith.addf %48, %47 : vector<2x128xf32>
      %50 = arith.divf %48, %49 : vector<2x128xf32>
      %51 = math.tanh %45 : vector<2x128xf32>
      %52 = vector.extract_strided_slice %50 {offsets = [0, 0], sizes = [2, 32], strides = [1, 1]} : vector<2x128xf32> to vector<2x32xf32>
      %53 = vector.extract_strided_slice %50 {offsets = [0, 32], sizes = [2, 32], strides = [1, 1]} : vector<2x128xf32> to vector<2x32xf32>
      %54 = vector.extract_strided_slice %51 {offsets = [0, 64], sizes = [2, 32], strides = [1, 1]} : vector<2x128xf32> to vector<2x32xf32>
      %55 = vector.extract_strided_slice %50 {offsets = [0, 96], sizes = [2, 32], strides = [1, 1]} : vector<2x128xf32> to vector<2x32xf32>
      %56 = arith.mulf %53, %arg16 : vector<2x32xf32>
      %57 = arith.mulf %52, %54 : vector<2x32xf32>
      %58 = arith.addf %56, %57 : vector<2x32xf32>
      %59 = math.tanh %58 : vector<2x32xf32>
      %60 = arith.mulf %55, %59 : vector<2x32xf32>
      %61 = arith.truncf %60 : vector<2x32xf32> to vector<2x32xbf16>
      %cst_34 = arith.constant dense<0.000000e+00> : vector<2x128xf32>
      %62 = tpu.matmul %61, %34, %cst_34 {dimension_numbers = #tpu.dot_dimension_numbers<[1], [0], [0], [1], [0, 0, 1, 1], [], []>} : vector<2x32xbf16>, vector<32x128xbf16>, vector<2x128xf32> -> vector<2x128xf32>
      %63 = vector.broadcast %35 : vector<1x128xf32> to vector<2x128xf32>
      %64 = arith.addf %62, %63 : vector<2x128xf32>
      %65 = tpu.iota {dimensions = array<i32: 1>} : vector<2x128xi32>
      %cst_35 = arith.constant dense<0xFF800000> : vector<2xf32>
      %66 = vector.multi_reduction <maximumf>, %64, %cst_35 [1] : vector<2x128xf32> to vector<2xf32>
      %67 = vector.shape_cast %66 : vector<2xf32> to vector<2x1xf32>
      %68 = vector.broadcast %67 : vector<2x1xf32> to vector<2x128xf32>
      %69 = arith.cmpf oeq, %64, %68 : vector<2x128xf32>
      %c128_i32 = arith.constant 128 : i32
      %70 = vector.broadcast %c128_i32 : i32 to vector<2x128xi32>
      %71 = arith.select %69, %65, %70 : vector<2x128xi1>, vector<2x128xi32>
      %cst_36 = arith.constant dense<2147483647> : vector<2xi32>
      %72 = vector.multi_reduction <minsi>, %71, %cst_36 [1] : vector<2x128xi32> to vector<2xi32>
      %73 = vector.shape_cast %72 : vector<2xi32> to vector<2x1xi32>
      %74 = arith.index_cast %arg13 : i32 to index
      %c0_37 = arith.constant 0 : index
      %c0_38 = arith.constant 0 : index
      %75 = vector.load %arg12[%74, %c0_37, %c0_38] : memref<20x2x1xi32, #tpu.memory_space<vmem>>, vector<1x2x1xi32>
      %76 = vector.shape_cast %75 : vector<1x2x1xi32> to vector<2x1xi32>
      %77 = vector.shape_cast %73 : vector<2x1xi32> to vector<1x2x1xi32>
      tpu.vector_store %arg12[%74, %c0_37, %c0_38], %77 {strides = array<i32>} : memref<20x2x1xi32, #tpu.memory_space<vmem>>, vector<1x2x1xi32>,
      %78 = vector.broadcast %73 : vector<2x1xi32> to vector<2x128xi32>
      %79 = arith.cmpi eq, %65, %78 : vector<2x128xi32>
      %80 = arith.extui %79 : vector<2x128xi1> to vector<2x128xi32>
      %81 = arith.sitofp %80 : vector<2x128xi32> to vector<2x128xf32>
      %82 = arith.truncf %81 : vector<2x128xf32> to vector<2x128xbf16>
      %cst_39 = arith.constant dense<0.000000e+00> : vector<2x32xf32>
      %83 = tpu.matmul %82, %36, %cst_39 {dimension_numbers = #tpu.dot_dimension_numbers<[1], [0], [0], [1], [0, 0, 1, 1], [], []>} : vector<2x128xbf16>, vector<128x32xbf16>, vector<2x32xf32> -> vector<2x32xf32>
      scf.yield %83, %60, %58 : vector<2x32xf32>, vector<2x32xf32>, vector<2x32xf32>
    }
    %c20_i32_31 = arith.constant 20 : i32
    return
  }
}

</mosaic_0001>

<bundles_post_ra>
// kernel: _bfm_forward_impl.1
= control target key start
LH: loop header
LB: loop body
LE: loop exit
PB: predicated region body
PF: predicated region fallthrough
CT: control target
= control target key end

     0   :  { %vm97_vm0 = vcmask 1044480   ;;  %vm98_vm1 = vcmask 1045504   ;;  %v859_v1 = vmov 65535   ;;  %v860_v3 = vmov 0   ;;  %s1216_s0 = inlined_call_operand.vmem [shape: bf16[27,512], index: 0, kind: input, shape index: {}]   ;;  %s1217_s12 = inlined_call_operand.vmem [shape: s32[20,2,1], index: 12, kind: output, shape index: {}]   ;;  %s1218_s2 = inlined_call_operand.vmem [shape: f32[8,1], index: 2, kind: input, shape index: {}]   ;;  %s1219_s1 = inlined_call_operand.vmem [shape: bf16[8,27], index: 1, kind: input, shape index: {}]   ;;  %s1220_s3 = inlined_call_operand.vmem [shape: bf16[8,32], index: 3, kind: input, shape index: {}]   ;;  %s1221_s7 = inlined_call_operand.vmem [shape: bf16[64,128], index: 7, kind: input, shape index: {}]   ;;  %s1222_s8 = inlined_call_operand.vmem [shape: f32[1,128], index: 8, kind: input, shape index: {}]   ;;  %s1223_s9 = inlined_call_operand.vmem [shape: bf16[32,128], index: 9, kind: input, shape index: {}]   ;;  %s1224_s10 = inlined_call_operand.vmem [shape: f32[1,128], index: 10, kind: input, shape index: {}]   ;;  %s1225_s11 = inlined_call_operand.vmem [shape: bf16[128,32], index: 11, kind: input, shape index: {}]   ;;  %s1226_s4 = inlined_call_operand.vmem [shape: f32[1,32], index: 4, kind: input, shape index: {}]   ;;  %s1227_s5 = inlined_call_operand.vmem [shape: f32[1,32], index: 5, kind: input, shape index: {}]   ;;  %s1228_s6 = inlined_call_operand.vmem [shape: f32[1,32], index: 6, kind: input, shape index: {}]  }
   0x1   :  { %v807_v0 = vld [vmem:[%s1216_s0 + $0x4] ss:$16 sps:$4 sm:$0xff]   ;;  %v99_v2 = vsel %vm97_vm0, 4294967295, %v859_v1  ;;  %145 = vmatprep.mubr.bf16.mxu0 %v860_v3  ;;  %186 = vmatprep.mubr.bf16.mxu1 %v860_v3  ;;  %v809_v4 = vld [vmem:[%s1216_s0 + $0xc] ss:$16 sps:$4 sm:$0xff]   ;;  %vm93_vm2 = vcmask 220160  }
   0x2   :  { %806 = vset.pattern.permute.xlu0 %v860_v3  ;;  %113 = vmatprep.subr.bf16.mxu0 %v807_v0  ;;  %v811_v5 = vld [vmem:[%s1216_s0] ss:$16 sps:$4 sm:$0xff]   ;;  %v812_v6 = vld [vmem:[%s1216_s0 + $0x8] ss:$16 sps:$4 sm:$0xff]   ;;  %v100_v7 = vsel %vm98_vm1, %v99_v2, 0  ;;  %vm255_vm3 = vcmask 1043456  }
   0x3   :  { %154 = vmatprep.subr.bf16.mxu1 %v809_v4  ;;  %v813_v8 = vld [vmem:[%s1216_s0 + $0x24] ss:$16 sps:$4 sm:$0x3f]   ;;  %114 = vmatpush1.bf16.msra.mxu0 %v811_v5  ;;  %v815_v9 = vld [vmem:[%s1216_s0 + $0x2c] ss:$16 sps:$4 sm:$0x3f]  }
   0x4   :  { %155 = vmatpush1.bf16.msra.mxu1 %v812_v6  ;;  %v51_v10 = vld [vmem:[%s1218_s2] sm:$0xff]  ;;  %v105_v11 = vand.u32 %v813_v8, %v100_v7  ;;  %v818_v13 = vld [vmem:[%s1216_s0 + $0x28] ss:$16 sps:$4 sm:$0x3f]   ;;  %v111_v14 = vand.u32 %v815_v9, %v100_v7  ;;  %v861_v37 = vmov 0.0   ;;  %vm208_vm4 = vcmask 7168  }
   0x5   :  { %v817_v12 = vld [vmem:[%s1216_s0 + $0x20] ss:$16 sps:$4 sm:$0x3f]   ;;  %54 = vperm.xlu0 %806, %v51_v10   ;;  %v108_v16 = vand.u32 %v818_v13, %v100_v7  ;;  %vm862_vm5 = vmmov 0   ;;  %vm251_vm6 = vcmask 64512  }
   0x6   :  { %115 = vmatprep.subr.bf16.mxu0 %v105_v11  ;;  %v102_v15 = vand.u32 %v817_v12, %v100_v7  ;;  %156 = vmatprep.subr.bf16.mxu1 %v111_v14  ;;  %v42_v17 = vld [vmem:[%s1219_s1] sm:$0xf]  ;;  %v974_v48 = vld [vmem:[%s1221_s7 + $0x4] sm:$0xf]  ;;  %v979_v49 = vld [vmem:[%s1221_s7 + $0x8] sm:$0xf] }
   0x7   :  { %v243_v38 = vld [vmem:[%s1220_s3] sm:$0xf]  ;;  %v984_v50 = vld [vmem:[%s1221_s7 + $0xc] sm:$0xf]  ;;  %v989_v51 = vld [vmem:[%s1221_s7 + $0x10] sm:$0xf] }
   0x8   :  { %116 = vmatpush1.bf16.msra.mxu0 %v102_v15  ;;  %157 = vmatpush1.bf16.msra.mxu1 %v108_v16  ;;  %v257_v39 = vsel %vm255_vm3, %v243_v38, 0  ;;  %v969_v47 = vld [vmem:[%s1221_s7] sm:$0xf]  ;;  %v994_v52 = vld [vmem:[%s1221_s7 + $0x14] sm:$0xf] }
   0x9   :  { %719 = vmatprep.subr.bf16.mxu0 %v861_v37  ;;  %v999_v53 = vld [vmem:[%s1221_s7 + $0x18] sm:$0xf]  ;;  %v1004_v54 = vld [vmem:[%s1221_s7 + $0x1c] sm:$0xf]  ;;  %v1009_v55 = vld [vmem:[%s1222_s8] ss:$0 sm:$0xff] }
   0xa   :  { %v1014_v56 = vld [vmem:[%s1223_s9] sm:$0xf]  ;;  %v1019_v57 = vld [vmem:[%s1223_s9 + $0x4] sm:$0xf]  ;;  %v1024_v58 = vld [vmem:[%s1223_s9 + $0x8] sm:$0xf] }
   0xb   :  { %671 = vmatmul.mubr.msk.bf16.vlgmr.msra.gmra.mrb[0].mxu0 %vm93_vm2, %v42_v17  ;;  %672 = vmatmul.mubr.msk.bf16.vlgmr.msra.gmra.mrb[0].mxu1 %vm93_vm2, %v42_v17  ;;  %v1029_v59 = vld [vmem:[%s1223_s9 + $0xc] sm:$0xf]  ;;  %v1034_v60 = vld [vmem:[%s1224_s10] ss:$0 sm:$0xff]  ;;  %v1044_v62 = vld [vmem:[%s1225_s11 + $0x4] sm:$0xf] }
   0xc   :  { %720 = vmatpush3.bf16.msra.mxu0 %v257_v39  ;;  %721 = vmatprep.mubr.msk.bf16.mxu0 %vm862_vm5, %v861_v37  ;;  %v1039_v61 = vld [vmem:[%s1225_s11] sm:$0xf]  ;;  %v1049_v63 = vld [vmem:[%s1225_s11 + $0x8] sm:$0xf]  ;;  %v1054_v0 = vld [vmem:[%s1225_s11 + $0xc] sm:$0xf] }
   0xd   :  { %v1059_v1 = vld [vmem:[%s1225_s11 + $0x10] sm:$0xf]  ;;  %v1064_v2 = vld [vmem:[%s1225_s11 + $0x14] sm:$0xf]  ;;  %v1069_v3 = vld [vmem:[%s1225_s11 + $0x18] sm:$0xf] }
   0xe   :  { %v1074_v4 = vld [vmem:[%s1225_s11 + $0x1c] sm:$0xf]  ;;  %v1079_v5 = vld [vmem:[%s1225_s11 + $0x20] sm:$0xf]  ;;  %v1084_v6 = vld [vmem:[%s1225_s11 + $0x24] sm:$0xf] }
   0xf   :  { %v1089_v7 = vld [vmem:[%s1225_s11 + $0x28] sm:$0xf]  ;;  %v1094_v8 = vld [vmem:[%s1225_s11 + $0x2c] sm:$0xf]  ;;  %v1099_v9 = vld [vmem:[%s1225_s11 + $0x30] sm:$0xf] }
  0x10   :  { %v1104_v10 = vld [vmem:[%s1225_s11 + $0x34] sm:$0xf]  ;;  %v1109_v11 = vld [vmem:[%s1225_s11 + $0x38] sm:$0xf]  ;;  %v1114_v12 = vld [vmem:[%s1225_s11 + $0x3c] sm:$0xf] }
  0x11   :  { %v673_v13 = vld [vmem:[%s1226_s4] ss:$0 sm:$0xff]  ;;  %s1131_s4 = smov 0  }
  0x12   :  { %v675_v15 = vld [vmem:[%s1227_s5] ss:$0 sm:$0xff] }
  0x84   :  { %v55_v18 = vpop.permute.xlu0 %54 }
  0xde   :  { %v147_v19 = vpop.f32.mrb[0].mxu0  ;;  %v188_v20 = vpop.f32.mrb[0].mxu1 }
  0xdf   :  { %v148_v21 = vadd.f32 %v147_v19, %v55_v18  ;;  %v189_v22 = vadd.f32 %v188_v20, %v55_v18  ;;  %v149_v23 = vpop.f32.mrb[1].mxu0  ;;  %v190_v24 = vpop.f32.mrb[1].mxu1 }
  0xe0   :  { %v150_v25 = vadd.f32 %v149_v23, %v55_v18  ;;  %v191_v26 = vadd.f32 %v190_v24, %v55_v18  ;;  %v151_v27 = vpop.f32.mrb[2].mxu0  ;;  %v192_v28 = vpop.f32.mrb[2].mxu1  ;;  %v676_v18 = vld [vmem:[%s1228_s6] ss:$0 sm:$0xff]  ;;  %v1125_v23 = vmov 0.0   ;;  %v1127_v24 = vmov 0.0  }
  0xe1   :  { %v195_v29 = vmax.f32 %v148_v21, 0.0  ;;  %v197_v30 = vmax.f32 %v189_v22, 0.0  ;;  %v152_v31 = vpop.f32.mrb[3].mxu0  ;;  %v193_v32 = vpop.f32.mrb[3].mxu1 }
  0xe2   :  { %v196_v33 = vmax.f32 %v150_v25, 0.0  ;;  %v198_v34 = vmax.f32 %v191_v26, 0.0 }
  0xe4   :  { %v204_v35 = vadd.f32 %v198_v34, %v197_v30  ;;  %v199_v36 = vadd.f32 %v196_v33, %v195_v29 }
  0xe6   :  { %205 = vadd.xlane.f32.xlu1 %v204_v35  ;;  %200 = vadd.xlane.f32.xlu0 %v199_v36 }
 0x173   :  { %v206_v40 = vpop.xlane.xlu1 %205  ;;  %v201_v41 = vpop.xlane.xlu0 %200 }
 0x174   :  { %v207_v42 = vmul.f32 0.00390625, %v206_v40  ;;  %v203_v43 = vmul.f32 0.00390625, %v201_v41 }
 0x176   :  { %v209_v44 = vsel %vm208_vm4, %v203_v43, %v207_v42 }
 0x177   :  { %210 = vxpose.xlu1.b32.start.end [1/1] (short) (narrow) %v209_v44, 8 }
 0x1f7   :  { %v226_v45 = vpop.trf.xlu1 }
 0x1f8   :  { %v242_v46 = vpack.c.bf16 %v226_v45, %v226_v45 }
 0x1fa   :  { %722 = vmatmul.mubr.msk.bf16.vlgmr.msra.gmra.mrb[4].mxu0 %vm251_vm6, %v242_v46 }
 0x2cd   :  { %v293_v14 = vpop.f32.mrb[4].mxu0 }
 0x2ce   :  { %v294_v16 = vadd.f32 %v673_v13, %v293_v14  ;;  %v723_v17 = vpop.f32.mrb[5].mxu0 }
 0x2cf   :  { %v296_v19 = vpop.f32.mrb[6].mxu0 }
 0x2d0   :  { %v306_v20 = vmul.f32 %v675_v15, %v294_v16  ;;  %v724_v21 = vpop.f32.mrb[7].mxu0 }
 0x2d2   :  { %v314_v22 = vadd.f32 %v676_v18, %v306_v20  }
 0x2d3 LB: > { %v678_v25 = vcombine.low %v969_v47, %v974_v48  ;;  %v863_v26 = vmov 0.0   ;;  %s864_s5 = smov 64   ;;  %v679_v27 = vcombine.low %v979_v49, %v984_v50  ;;  %vm865_vm7 = vmmov 0   ;;  %s866_s6 = smov 32   ;;  %s857_s4 = sphi %s1131_s4, %s350_s4   ;;  %v853_v22 = vphi %v314_v22, %v637_v22   ;;  %v849_v24 = vphi %v1127_v24, %v1172_v24   ;;  %v845_v23 = vphi %v1125_v23, %v1163_v23  }
 0x2d4   : > { %725 = vmatprep.subr.bf16.mxu0 %v863_v26  ;;  %745 = vmatprep.subr.bf16.mxu1 %v863_v26  ;;  %v680_v28 = vcombine.low %v989_v51, %v994_v52  ;;  %v681_v29 = vcombine.low %v999_v53, %v1004_v54  ;;  %vm358_vm8 = vcmask 261120   ;;  %vm391_vm9 = vcmask 523264   ;;  %s688_s11 = sshll.u32 %s857_s4, 1  ;;  %s350_s4 = sadd.s32 1, %s857_s4  }
 0x2d5   : > { %355 = vrot.lane.b32.xlu0 %v849_v24, %s864_s5  ;;  %726 = vmatpush3.bf16.msra.mxu0 %v678_v25  ;;  %v685_v13 = vcombine.low %v1014_v56, %v1019_v57  ;;  %v686_v14 = vcombine.low %v1024_v58, %v1029_v59  ;;  %vm526_vm10 = vcmask 1041408   ;;  %s548_s19 = scalar_lea.vmem %s1217_s12, %s688_s11  ;;  %vm549_vm13 = vcmask 1024   ;;  %p347_p0 = scmp.ge.s32.totalorder %s350_s4, 20  }
 0x2d6   : > { %727 = vmatprep.subr.bf16.mxu0 %v863_v26  ;;  %733 = vmatprep.mubr.msk.bf16.mxu0 %vm865_vm7, %v863_v26 }
 0x2d7   : > { %761 = vmatprep.mubr.msk.bf16.mxu1 %vm865_vm7, %v863_v26 }
 0x2d9   : > { %728 = vmatpush3.bf16.msra.mxu0 %v679_v27 }
 0x2da   : > { %729 = vmatprep.subr.bf16.mxu0 %v863_v26 }
 0x2dd   : > { %730 = vmatpush3.bf16.msra.mxu0 %v680_v28  ;;  %v524_v28 = vlaneseq }
 0x2de   : > { %731 = vmatprep.subr.bf16.mxu0 %v863_v26 }
 0x2e1   : > { %732 = vmatpush3.bf16.msra.mxu0 %v681_v29  ;;  %v525_v29 = vand.u32 127, %v524_v28 }
 0x2e2   : > { %737 = vmatprep.subr.bf16.mxu0 %v863_v26 }
 0x347   : > { %v356_v30 = vpop.permute.xlu0 %355 }
 0x348   : > { %v359_v31 = vsel %vm358_vm8, %v853_v22, %v356_v30 }
 0x349   : > { %v360_v32 = vpack.c.bf16 %v359_v31, %v359_v31 }
 0x34b   : > { %734 = vmatmul.mubr.msk.bf16.vlgmr.msra.gmra.mrb[0].mxu0 %vm391_vm9, %v360_v32 }
 0x34c   : > { %741 = vmatprep.mubr.msk.bf16.mxu0 %vm865_vm7, %v863_v26  ;;  %738 = vmatpush3.bf16.msra.mxu0 %v685_v13 }
 0x34d   : > { %739 = vmatprep.subr.bf16.mxu0 %v863_v26 }
 0x350   : > { %740 = vmatpush3.bf16.msra.mxu0 %v686_v14 }
 0x41e   : > { %v429_v33 = vpop.f32.mrb[0].mxu0 }
 0x41f   : > { %v430_v34 = vadd.f32 %v1009_v55, %v429_v33  ;;  %v735_v35 = vpop.f32.mrb[1].mxu0 }
 0x420   : > { %v432_v36 = vpop.f32.mrb[2].mxu0  ;;  %v690_v35 = vcombine.low %v1039_v61, %v1044_v62 }
 0x421   : > { %819 = vtanh.f32 %v430_v34  ;;  %v736_v37 = vpop.f32.mrb[3].mxu0  ;;  %v683_v39 = vmul.f32 -1.442695, %v430_v34  ;;  %v691_v36 = vcombine.low %v1049_v63, %v1054_v0 }
 0x422   : > { %746 = vmatpush3.bf16.msra.mxu1 %v690_v35  ;;  %v692_v37 = vcombine.low %v1059_v1, %v1064_v2 }
 0x423   : > { %821 = vpow2.f32 %v683_v39  ;;  %747 = vmatprep.subr.bf16.mxu1 %v863_v26  ;;  %v694_v39 = vcombine.low %v1079_v5, %v1084_v6 }
 0x426   : > { %748 = vmatpush3.bf16.msra.mxu1 %v691_v36 }
 0x427   : > { %749 = vmatprep.subr.bf16.mxu1 %v863_v26 }
 0x42a   : > { %750 = vmatpush3.bf16.msra.mxu1 %v692_v37 }
 0x42b   : > { %v820_v38 = vpop.eup %819  ;;  %751 = vmatprep.subr.bf16.mxu1 %v863_v26 }
 0x42c   : > { %444 = vrot.lane.b32.xlu0 %v820_v38, %s864_s5  ;;  %v693_v38 = vcombine.low %v1069_v3, %v1074_v4 }
 0x42d   : > { %v822_v40 = vpop.eup %821 }
 0x42e   : > { %v438_v41 = vadd.f32 1.0, %v822_v40  ;;  %752 = vmatpush3.bf16.msra.mxu1 %v693_v38  ;;  %v695_v40 = vcombine.low %v1089_v7, %v1094_v8 }
 0x42f   : > { %753 = vmatprep.subr.bf16.mxu1 %v863_v26 }
 0x430   : > { %823 = vrcp.f32 %v438_v41  ;;  %v696_v41 = vcombine.low %v1099_v9, %v1104_v10 }
 0x432   : > { %754 = vmatpush3.bf16.msra.mxu1 %v694_v39 }
 0x433   : > { %755 = vmatprep.subr.bf16.mxu1 %v863_v26 }
 0x436   : > { %756 = vmatpush3.bf16.msra.mxu1 %v695_v40 }
 0x437   : > { %757 = vmatprep.subr.bf16.mxu1 %v863_v26 }
 0x43a   : > { %v824_v42 = vpop.eup %823  ;;  %758 = vmatpush3.bf16.msra.mxu1 %v696_v41 }
 0x43b   : > { %v442_v45 = vmul.f32 %v845_v23, %v824_v42  ;;  %759 = vmatprep.subr.bf16.mxu1 %v863_v26 }
 0x49e   : > { %v445_v43 = vpop.permute.xlu0 %444 }
 0x49f   : > { %v447_v44 = vmul.f32 %v824_v42, %v445_v43 }
 0x4a1   : > { %449 = vrot.lane.b32.xlu1 %v447_v44, %s866_s6 }
 0x513   : > { %v450_v46 = vpop.permute.xlu1 %449 }
 0x514   : > { %v1163_v23 = vadd.f32 %v450_v46, %v442_v45   ;;  %v697_v46 = vcombine.low %v1109_v11, %v1114_v12 }
 0x516   : > { %825 = vtanh.f32 %v1163_v23  ;;  %760 = vmatpush3.bf16.msra.mxu1 %v697_v46 }
 0x520   : > { %v826_v15 = vpop.eup %825 }
 0x521   : > { %455 = vrot.lane.b32.xlu1 %v826_v15, %s864_s5 }
 0x593   : > { %v456_v16 = vpop.permute.xlu1 %455 }
 0x594   : > { %v1172_v24 = vmul.f32 %v824_v42, %v456_v16  }
 0x596   : > { %v459_v17 = vpack.c.bf16 %v1172_v24, %v1172_v24 }
 0x598   : > { %467 = vrot.lane.b32.xlu0 %v459_v17, %s866_s6  ;;  %v867_v17 = vmov 1.0|1.0  }
 0x60a   : > { %v468_v18 = vpop.permute.xlu0 %467 }
 0x60b   : > { %742 = vmatmul.mubr.msk.bf16.vlgmr.msra.gmra.mrb[4].mxu0 %vm358_vm8, %v468_v18 }
 0x6de   : > { %v518_v19 = vpop.f32.mrb[4].mxu0 }
 0x6df   : > { %v519_v20 = vadd.f32 %v1034_v60, %v518_v19  ;;  %v743_v21 = vpop.f32.mrb[5].mxu0 }
 0x6e0   : > { %v521_v22 = vpop.f32.mrb[6].mxu0 }
 0x6e1   : > { %v744_v25 = vpop.f32.mrb[7].mxu0  ;;  %v527_v27 = vsel %vm526_vm10, %v519_v20, -inf }
 0x6e2   : > { %528 = vmax.xlane.f32.xlu1 %v527_v27 }
 0x76f   : > { %v529_v30 = vpop.xlane.xlu1 %528 }
 0x770   : > { %vm530_vm11 = vcmp.eq.f32.partialorder %v519_v20, %v529_v30 }
 0x771   : > { %v531_v31 = vsel %vm530_vm11, %v525_v29, 128 }
 0x772   : > { %v532_v32 = vsel %vm526_vm10, %v531_v31, 2147483647 }
 0x773   : > { %v534_v33 = vshra.s32 %v532_v32, 16  ;;  %v533_v42 = vand.u32 65535, %v532_v32 }
 0x775   : > { %v536_v34 = vcvt.s32.f32 %v534_v33  ;;  %v535_v44 = vcvt.s32.f32 %v533_v42 }
 0x777   : > { %537 = vmin.xlane.f32.xlu0 %v536_v34 }
 0x804   : > { %v538_v43 = vpop.xlane.xlu0 %537 }
 0x805   : > { %vm539_vm12 = vcmp.eq.f32.partialorder %v536_v34, %v538_v43  ;;  %v544_v13 = vcvt.f32.s32 %v538_v43 }
 0x806   : > { %v540_v45 = vsel %vm539_vm12, %v535_v44, inf }
 0x807   : > { %541 = vmin.xlane.f32.xlu0 %v540_v45  ;;  %v545_v15 = vshll.u32 %v544_v13, 16 }
 0x894   : > { %v542_v14 = vpop.xlane.xlu0 %541 }
 0x895   : > { %v543_v16 = vcvt.f32.s32 %v542_v14 }
 0x897   : > { %v546_v26 = vadd.s32 %v545_v15, %v543_v16 }
 0x899   : > { %550 = vst.msk [vmem:[%s548_s19] sm:$0x3] %vm549_vm13, %v546_v26  ;;  %vm551_vm14 = vcmp.eq.s32.totalorder %v525_v29, %v546_v26 }
 0x89a   : > { %vm698_vm15 = vmpackc.low %vm551_vm14, %vm551_vm14 }
 0x89b   : > { %762 = vmatmul.mubr.msk.bf16.vlgmr.msra.gmra.mrb[0].mxu1 %vm698_vm15, %v867_v17 }
 0x96b   :  { %349 = sbr.rel (!%p347_p0) target bundleno = 723 (0x2d3), region = 76 }
 0x96e   : > { %v637_v22 = vpop.f32.mrb[0].mxu1  }
 0x96f   : > { %v763_v18 = vpop.f32.mrb[1].mxu1 }
 0x970   : > { %v640_v19 = vpop.f32.mrb[2].mxu1 }
 0x971   : > { %v764_v20 = vpop.f32.mrb[3].mxu1 }

</bundles_post_ra>
